<compile_context>
chip_gen: v5e
topology: v5e:2x2
jax: 0.10.0
libtpu: 0.0.40
codegen_flags: <defaults>
</compile_context>

<pallas_src>
import math
import functools

import jax
import jax.numpy as jnp
from jax import lax
from jax.experimental import pallas as pl
from jax.experimental.pallas import tpu as pltpu

NEG_INF = -1e30                      # finite "minus infinity" for masking
VMEM_LIMIT_BYTES = 32 * 1024 * 1024  # explicit scoped-VMEM budget (safe on v5e/v6e/v7x)


def _choose_block(t):
    """Largest nice tile that divides t (full extent for small t)."""
    if t <= 256:
        return t
    for cand in (256, 128, 64, 32, 16, 8):
        if t % cand == 0:
            return cand
    return t


# --------------------------------------------------------------------------- #
# Kernel 1: fused QKV projection                                              #
# --------------------------------------------------------------------------- #
def _qkv_kernel(x_ref, w_ref, b_ref, q_ref, k_ref, v_ref):
    C = q_ref.shape[-1]
    xt = x_ref[0]                                                     # (tq, C) bf16
    res = jnp.dot(xt, w_ref[...], preferred_element_type=jnp.float32) # (tq, 3C) f32
    res = res + b_ref[...]
    q_ref[0] = res[:, :C].astype(q_ref.dtype)         # already scaled by 1/sqrt(hd)
    k_ref[0] = res[:, C:2 * C].astype(k_ref.dtype)
    v_ref[0] = res[:, 2 * C:].astype(v_ref.dtype)


# --------------------------------------------------------------------------- #
# Kernel 2: flash attention (online softmax) + fused output projection        #
# --------------------------------------------------------------------------- #
def _flash_proj_kernel(q_ref, k_ref, v_ref, wp_ref, bp_ref, o_ref,
                       m_ref, l_ref, acc_ref, *, n_head):
    tq, C = acc_ref.shape
    tkv = k_ref.shape[1]
    hd = C // n_head
    i = pl.program_id(1)              # q-tile index
    j = pl.program_id(2)              # kv-tile index (reduction axis)

    @pl.when(j == 0)
    def _init():
        m_ref[...] = jnp.full_like(m_ref, NEG_INF)
        l_ref[...] = jnp.zeros_like(l_ref)
        acc_ref[...] = jnp.zeros_like(acc_ref)

    # Skip kv tiles that lie entirely above the causal diagonal (~2x FLOP cut).
    q_last_row = i * tq + (tq - 1)
    kv_first_col = j * tkv

    @pl.when(kv_first_col <= q_last_row)
    def _compute():
        q_all = q_ref[0]              # (tq,  C) bf16, q pre-scaled by 1/sqrt(hd)
        k_all = k_ref[0]              # (tkv, C) bf16
        v_all = v_ref[0]              # (tkv, C) bf16

        row = i * tq + lax.broadcasted_iota(jnp.int32, (tq, tkv), 0)
        col = j * tkv + lax.broadcasted_iota(jnp.int32, (tq, tkv), 1)
        causal = col <= row

        # Per-head attention from static column slices (no reshapes/transposes).
        for h in range(n_head):
            sl = slice(h * hd, (h + 1) * hd)
            q_h = q_all[:, sl]
            k_h = k_all[:, sl]
            v_h = v_all[:, sl]

            # s = q_h @ k_h^T without materializing the transpose.
            s = lax.dot_general(q_h, k_h, (((1,), (1,)), ((), ())),
                                preferred_element_type=jnp.float32)   # (tq, tkv)
            s = jnp.where(causal, s, NEG_INF)

            m_prev = m_ref[h]                                         # (tq, 1)
            m_cur = jnp.max(s, axis=-1, keepdims=True)
            m_new = jnp.maximum(m_prev, m_cur)
            alpha = jnp.exp(m_prev - m_new)
            p = jnp.exp(s - m_new)                                    # f32 probs

            l_ref[h] = alpha * l_ref[h] + jnp.sum(p, axis=-1, keepdims=True)
            m_ref[h] = m_new
            acc_ref[:, sl] = alpha * acc_ref[:, sl] + jnp.dot(
                p.astype(v_h.dtype), v_h, preferred_element_type=jnp.float32)

    @pl.when(j == pl.num_programs(2) - 1)
    def _finalize():
        # Normalize (EUP reciprocal), then fuse the output projection.
        for h in range(n_head):
            sl = slice(h * hd, (h + 1) * hd)
            acc_ref[:, sl] = acc_ref[:, sl] * pl.reciprocal(l_ref[h], approx=True)
        y = acc_ref[...].astype(q_ref.dtype)                          # bf16
        out = jnp.dot(y, wp_ref[...], preferred_element_type=jnp.float32)
        out = out + bp_ref[...]
        o_ref[0] = out.astype(o_ref.dtype)


# --------------------------------------------------------------------------- #
# Wrapper                                                                     #
# --------------------------------------------------------------------------- #
def causal_self_attention(x, params, n_head, *, block_q=None, block_kv=None):
    """x: (B, T, C) float32.  params: dict of (C_in, C_out) weights / (1, C) biases."""
    B, T, C = x.shape
    assert C % n_head == 0
    hd = C // n_head
    scale = 1.0 / math.sqrt(hd)

    tq = block_q or _choose_block(T)
    tkv = block_kv or _choose_block(T)
    assert T % tq == 0 and T % tkv == 0
    num_q, num_kv = T // tq, T // tkv

    cdt = jnp.bfloat16
    x_c = x.astype(cdt)
    # Fold the attention scale into Wq / bq; fuse QKV weights into one (C, 3C) slab.
    w_qkv = jnp.concatenate(
        [params["wq"] * scale, params["wk"], params["wv"]], axis=1).astype(cdt)
    b_qkv = jnp.concatenate(
        [params["bq"] * scale, params["bk"], params["bv"]], axis=1).astype(jnp.float32)
    wp = params["wp"].astype(cdt)
    bp = params["bp"].astype(jnp.float32)

    # --- kernel 1: fused QKV projection -------------------------------------
    qkv_cost = pl.CostEstimate(
        flops=2 * B * T * C * 3 * C,
        transcendentals=0,
        bytes_accessed=B * T * C * 2 + 3 * C * C * 2 + 3 * C * 4 + 3 * B * T * C * 2)

    q, k, v = pl.pallas_call(
        _qkv_kernel,
        out_shape=(jax.ShapeDtypeStruct((B, T, C), cdt),
                   jax.ShapeDtypeStruct((B, T, C), cdt),
                   jax.ShapeDtypeStruct((B, T, C), cdt)),
        grid_spec=pltpu.PrefetchScalarGridSpec(
            num_scalar_prefetch=0,
            grid=(B, num_q),
            in_specs=[
                pl.BlockSpec((1, tq, C), lambda b, i: (b, i, 0)),
                pl.BlockSpec((C, 3 * C), lambda b, i: (0, 0)),
                pl.BlockSpec((1, 3 * C), lambda b, i: (0, 0)),
            ],
            out_specs=(pl.BlockSpec((1, tq, C), lambda b, i: (b, i, 0)),
                       pl.BlockSpec((1, tq, C), lambda b, i: (b, i, 0)),
                       pl.BlockSpec((1, tq, C), lambda b, i: (b, i, 0))),
        ),
        compiler_params=pltpu.CompilerParams(
            dimension_semantics=("parallel", "parallel"),
            vmem_limit_bytes=VMEM_LIMIT_BYTES),
        cost_estimate=qkv_cost,
    )(x_c, w_qkv, b_qkv)

    # --- kernel 2: flash attention + output projection ----------------------
    flash_cost = pl.CostEstimate(
        flops=4 * B * T * T * C + 2 * B * T * C * C,
        transcendentals=B * n_head * T * T,
        bytes_accessed=3 * B * T * C * 2 + C * C * 2 + C * 4 + B * T * C * 4)

    kernel = functools.partial(_flash_proj_kernel, n_head=n_head)
    out = pl.pallas_call(
        kernel,
        out_shape=jax.ShapeDtypeStruct((B, T, C), x.dtype),
        grid_spec=pltpu.PrefetchScalarGridSpec(
            num_scalar_prefetch=0,
            grid=(B, num_q, num_kv),
            in_specs=[
                pl.BlockSpec((1, tq, C), lambda b, i, j: (b, i, 0)),    # q
                pl.BlockSpec((1, tkv, C), lambda b, i, j: (b, j, 0)),   # k
                pl.BlockSpec((1, tkv, C), lambda b, i, j: (b, j, 0)),   # v
                pl.BlockSpec((C, C), lambda b, i, j: (0, 0)),           # W_proj
                pl.BlockSpec((1, C), lambda b, i, j: (0, 0)),           # b_proj
            ],
            out_specs=pl.BlockSpec((1, tq, C), lambda b, i, j: (b, i, 0)),
            scratch_shapes=[
                pltpu.VMEM((n_head, tq, 1), jnp.float32),   # running max
                pltpu.VMEM((n_head, tq, 1), jnp.float32),   # running sum
                pltpu.VMEM((tq, C), jnp.float32),           # f32 accumulator
            ],
        ),
        compiler_params=pltpu.CompilerParams(
            dimension_semantics=("parallel", "parallel", "arbitrary"),
            vmem_limit_bytes=VMEM_LIMIT_BYTES),
        cost_estimate=flash_cost,
    )(q, k, v, wp, bp)

    return out


# --------------------------------------------------------------------------- #
# Init & reference                                                            #
# --------------------------------------------------------------------------- #
def init_params(key, n_embd):
    """Deterministic init mimicking nn.Linear's uniform(-1/sqrt(fan_in), +)."""
    ks = jax.random.split(key, 8)
    bound = 1.0 / math.sqrt(n_embd)

    def u(k, shape):
        return jax.random.uniform(k, shape, jnp.float32, -bound, bound)

    return {
        "wq": u(ks[0], (n_embd, n_embd)), "bq": u(ks[1], (1, n_embd)),
        "wk": u(ks[2], (n_embd, n_embd)), "bk": u(ks[3], (1, n_embd)),
        "wv": u(ks[4], (n_embd, n_embd)), "bv": u(ks[5], (1, n_embd)),
        "wp": u(ks[6], (n_embd, n_embd)), "bp": u(ks[7], (1, n_embd)),
    }


def reference(x, params, n_head):
    """Plain-JAX f32 reference mirroring the PyTorch forward (dropout = identity)."""
    B, T, C = x.shape
    hd = C // n_head
    q = (x @ params["wq"] + params["bq"]).reshape(B, T, n_head, hd).transpose(0, 2, 1, 3)
    k = (x @ params["wk"] + params["bk"]).reshape(B, T, n_head, hd).transpose(0, 2, 1, 3)
    v = (x @ params["wv"] + params["bv"]).reshape(B, T, n_head, hd).transpose(0, 2, 1, 3)
    att = jnp.einsum('bhtd,bhsd->bhts', q, k) * (1.0 / math.sqrt(hd))
    mask = jnp.tril(jnp.ones((T, T), bool))
    att = jnp.where(mask[None, None], att, -jnp.inf)
    att = jax.nn.softmax(att, axis=-1)
    y = jnp.einsum('bhts,bhsd->bhtd', att, v).transpose(0, 2, 1, 3).reshape(B, T, C)
    return y @ params["wp"] + params["bp"]


if __name__ == "__main__":
    B, T, C, n_head = 2, 8, 32, 4

    key = jax.random.PRNGKey(0)
    kx, kp = jax.random.split(key)
    x = jax.random.normal(kx, (B, T, C), jnp.float32)
    params = init_params(kp, C)

    out = causal_self_attention(x, params, n_head)
    out = jax.block_until_ready(out)

    # Compare against an f32 reference computed on bf16-rounded x / weights
    # (the kernel feeds the MXU bf16 operands with f32 accumulation).
    def rnd(a):
        return a.astype(jnp.bfloat16).astype(jnp.float32)

    params_r = {kk: (rnd(vv) if kk.startswith("w") else vv) for kk, vv in params.items()}
    ref = reference(rnd(x), params_r, n_head)

    assert out.shape == (B, T, C)
    err = float(jnp.max(jnp.abs(out - ref)))
    assert jnp.allclose(out, ref, atol=2e-2, rtol=2e-2), f"max abs err {err}"

    print("KERNEL_OK")
</pallas_src>

<mosaic_0001>
module attributes {stable_mosaic.version = 11 : i64} {
  func.func @_qkv_kernel(%arg0: i32, %arg1: i32, %arg2: memref<1x8x32xbf16, #tpu.memory_space<vmem>>, %arg3: memref<32x96xbf16, #tpu.memory_space<vmem>>, %arg4: memref<1x96xf32, #tpu.memory_space<vmem>>, %arg5: memref<1x8x32xbf16, #tpu.memory_space<vmem>>, %arg6: memref<1x8x32xbf16, #tpu.memory_space<vmem>>, %arg7: memref<1x8x32xbf16, #tpu.memory_space<vmem>>) attributes {dimension_semantics = [#tpu.dimension_semantics<parallel>, #tpu.dimension_semantics<parallel>], iteration_bounds = array<i64: 2, 1>, scalar_prefetch = 0 : i64, scratch_operands = 0 : i64, tpu.core_type = #tpu.core_type<tc>, window_params = [{transform_indices = @transform_0, window_bounds = array<i64: 1, 8, 32>}, {pipeline_mode = #tpu.pipeline_mode<synchronous>, transform_indices = @transform_1, window_bounds = array<i64: 32, 96>}, {pipeline_mode = #tpu.pipeline_mode<synchronous>, transform_indices = @transform_2, window_bounds = array<i64: 1, 96>}, {transform_indices = @transform_3, window_bounds = array<i64: 1, 8, 32>}, {transform_indices = @transform_4, window_bounds = array<i64: 1, 8, 32>}, {transform_indices = @transform_5, window_bounds = array<i64: 1, 8, 32>}]} {
    %c0 = arith.constant 0 : index
    %c0_0 = arith.constant 0 : index
    %c0_1 = arith.constant 0 : index
    %0 = vector.load %arg2[%c0, %c0_0, %c0_1] : memref<1x8x32xbf16, #tpu.memory_space<vmem>>, vector<1x8x32xbf16>
    %1 = vector.shape_cast %0 : vector<1x8x32xbf16> to vector<8x32xbf16>
    %c0_2 = arith.constant 0 : index
    %c0_3 = arith.constant 0 : index
    %2 = vector.load %arg3[%c0_2, %c0_3] : memref<32x96xbf16, #tpu.memory_space<vmem>>, vector<32x96xbf16>
    %cst = arith.constant dense<0.000000e+00> : vector<8x96xf32>
    %3 = tpu.matmul %1, %2, %cst {dimension_numbers = #tpu.dot_dimension_numbers<[1], [0], [0], [1], [0, 0, 1, 1], [], []>} : vector<8x32xbf16>, vector<32x96xbf16>, vector<8x96xf32> -> vector<8x96xf32>
    %c0_4 = arith.constant 0 : index
    %c0_5 = arith.constant 0 : index
    %4 = vector.load %arg4[%c0_4, %c0_5] : memref<1x96xf32, #tpu.memory_space<vmem>>, vector<1x96xf32>
    %5 = vector.broadcast %4 : vector<1x96xf32> to vector<8x96xf32>
    %6 = arith.addf %3, %5 : vector<8x96xf32>
    %7 = vector.extract_strided_slice %6 {offsets = [0, 0], sizes = [8, 32], strides = [1, 1]} : vector<8x96xf32> to vector<8x32xf32>
    %8 = arith.truncf %7 : vector<8x32xf32> to vector<8x32xbf16>
    %c0_6 = arith.constant 0 : index
    %c0_7 = arith.constant 0 : index
    %c0_8 = arith.constant 0 : index
    %9 = vector.load %arg5[%c0_6, %c0_7, %c0_8] : memref<1x8x32xbf16, #tpu.memory_space<vmem>>, vector<1x8x32xbf16>
    %10 = vector.shape_cast %9 : vector<1x8x32xbf16> to vector<8x32xbf16>
    %11 = vector.shape_cast %8 : vector<8x32xbf16> to vector<1x8x32xbf16>
    tpu.vector_store %arg5[%c0_6, %c0_7, %c0_8], %11 {strides = array<i32>} : memref<1x8x32xbf16, #tpu.memory_space<vmem>>, vector<1x8x32xbf16>,
    %12 = vector.extract_strided_slice %6 {offsets = [0, 32], sizes = [8, 32], strides = [1, 1]} : vector<8x96xf32> to vector<8x32xf32>
    %13 = arith.truncf %12 : vector<8x32xf32> to vector<8x32xbf16>
    %c0_9 = arith.constant 0 : index
    %c0_10 = arith.constant 0 : index
    %c0_11 = arith.constant 0 : index
    %14 = vector.load %arg6[%c0_9, %c0_10, %c0_11] : memref<1x8x32xbf16, #tpu.memory_space<vmem>>, vector<1x8x32xbf16>
    %15 = vector.shape_cast %14 : vector<1x8x32xbf16> to vector<8x32xbf16>
    %16 = vector.shape_cast %13 : vector<8x32xbf16> to vector<1x8x32xbf16>
    tpu.vector_store %arg6[%c0_9, %c0_10, %c0_11], %16 {strides = array<i32>} : memref<1x8x32xbf16, #tpu.memory_space<vmem>>, vector<1x8x32xbf16>,
    %17 = vector.extract_strided_slice %6 {offsets = [0, 64], sizes = [8, 32], strides = [1, 1]} : vector<8x96xf32> to vector<8x32xf32>
    %18 = arith.truncf %17 : vector<8x32xf32> to vector<8x32xbf16>
    %c0_12 = arith.constant 0 : index
    %c0_13 = arith.constant 0 : index
    %c0_14 = arith.constant 0 : index
    %19 = vector.load %arg7[%c0_12, %c0_13, %c0_14] : memref<1x8x32xbf16, #tpu.memory_space<vmem>>, vector<1x8x32xbf16>
    %20 = vector.shape_cast %19 : vector<1x8x32xbf16> to vector<8x32xbf16>
    %21 = vector.shape_cast %18 : vector<8x32xbf16> to vector<1x8x32xbf16>
    tpu.vector_store %arg7[%c0_12, %c0_13, %c0_14], %21 {strides = array<i32>} : memref<1x8x32xbf16, #tpu.memory_space<vmem>>, vector<1x8x32xbf16>,
    return
  }
  func.func @transform_0(%arg0: i32, %arg1: i32) -> (i32, i32, i32) {
    %c0_i32 = arith.constant 0 : i32
    %c0_i32_0 = arith.constant 0 : i32
    return %arg0, %arg1, %c0_i32 : i32, i32, i32
  }
  func.func @transform_1(%arg0: i32, %arg1: i32) -> (i32, i32) {
    %c0_i32 = arith.constant 0 : i32
    %c0_i32_0 = arith.constant 0 : i32
    %c0_i32_1 = arith.constant 0 : i32
    return %c0_i32, %c0_i32_0 : i32, i32
  }
  func.func @transform_2(%arg0: i32, %arg1: i32) -> (i32, i32) {
    %c0_i32 = arith.constant 0 : i32
    %c0_i32_0 = arith.constant 0 : i32
    %c0_i32_1 = arith.constant 0 : i32
    return %c0_i32, %c0_i32_0 : i32, i32
  }
  func.func @transform_3(%arg0: i32, %arg1: i32) -> (i32, i32, i32) {
    %c0_i32 = arith.constant 0 : i32
    %c0_i32_0 = arith.constant 0 : i32
    return %arg0, %arg1, %c0_i32 : i32, i32, i32
  }
  func.func @transform_4(%arg0: i32, %arg1: i32) -> (i32, i32, i32) {
    %c0_i32 = arith.constant 0 : i32
    %c0_i32_0 = arith.constant 0 : i32
    return %arg0, %arg1, %c0_i32 : i32, i32, i32
  }
  func.func @transform_5(%arg0: i32, %arg1: i32) -> (i32, i32, i32) {
    %c0_i32 = arith.constant 0 : i32
    %c0_i32_0 = arith.constant 0 : i32
    return %arg0, %arg1, %c0_i32 : i32, i32, i32
  }
}

</mosaic_0001>

<bundles_post_ra>
// kernel: tpu_custom_call.1
= control target key start
LH: loop header
LB: loop body
LE: loop exit
PB: predicated region body
PF: predicated region fallthrough
CT: control target
= control target key end

     0   :  { %s1119_s0 = inlined_call_operand.hbm [shape: bf16[2,8,32], index: 0, kind: input, shape index: {}]   ;;  %s1120_s1 = inlined_call_operand.hbm [shape: bf16[32,96], index: 1, kind: input, shape index: {}]   ;;  %s1121_s2 = inlined_call_operand.vmem [shape: f32[1,96], index: 2, kind: input, shape index: {}]   ;;  %s1122_s3 = inlined_call_operand.hbm [shape: bf16[2,8,32], index: 3, kind: output, shape index: {0}]   ;;  %s1123_s4 = inlined_call_operand.hbm [shape: bf16[2,8,32], index: 4, kind: output, shape index: {1}]   ;;  %s1124_s5 = inlined_call_operand.hbm [shape: bf16[2,8,32], index: 5, kind: output, shape index: {2}]  }
   0x1   :  { %1126 = sst [smem:[#allocation15_spill]] %s1119_s0 }
   0x2   :  { %11 = vsyncpa [#allocation3], 0 }
   0x3   :  { %13 = vsyncpa [#allocation3 + $0x1], 0 }
   0x4   :  { %14 = vsyncpa [#allocation6], 0 }
   0x5   :  { %15 = vsyncpa [#allocation4], 0 }
   0x6   :  { %17 = vsyncpa [#allocation4 + $0x1], 0 }
   0x7   :  { %18 = vsyncpa [#allocation9], 0 }
   0x8   :  { %20 = vsyncpa [#allocation9 + $0x1], 0  ;;  %s924_s18 = smov 0   ;;  %s926_s19 = smov 0  }
   0x9   :  { %s928_s20 = smov 0   ;;  %s930_s21 = smov 0  }
   0xa   :  { %s932_s22 = smov 0   ;;  %s934_s23 = smov 0  }
   0xb LB: > { %s955_s24 = sadd.s32 4294967295, %s887_s23   ;;  %p563_p0 = scmp.ge.s32.totalorder %s887_s23, 1  ;;  %s887_s23 = sphi %s934_s23, %s26_s23   ;;  %s883_s22 = sphi %s932_s22, %s1138_s22   ;;  %s879_s21 = sphi %s930_s21, %s1137_s21   ;;  %s875_s20 = sphi %s928_s20, %s1136_s20   ;;  %s871_s19 = sphi %s926_s19, %s1135_s19   ;;  %s867_s18 = sphi %s924_s18, %s1134_s18  }
   0xc   : > { %p61_p1 = scmp.eq.s32.totalorder %s955_s24, 0  ;;  %p197_p2 = scmp.lt.s32.totalorder %s887_s23, 3 }
   0xd   : > { %s208_s27 = sshll.u32 %s1120_s1, 4  ;;  %s889_s29 = smov [#allocation5]   ;;  %s209_s27 = int_to_ptr.hbm [resolvable:$true] %s208_s27 }
   0xe   : > { %p963_p3 = pnand %p563_p0, %p197_p2  ;;  %s210_s30 = sshll.u32 %s889_s29, 4  ;;  %s211_s30 = int_to_ptr.vmem [resolvable:$true] %s210_s30 }
   0xf   : > { %p565_p6 = scmp.ge.s32.totalorder %s887_s23, 2  ;;  %s890_s6 = smov 64  }
  0x10   : > { %p605_p4 = pneg %p963_p3  ;;  %s891_s7 = smov 4  }
  0x11   : > { %s1125_s8 = sadd.s32 4294967294, %s887_s23   ;;  %s38_s9 = sadd.s32 1, %s883_s22 }
  0x12   : > { %p606_p5 = pnand %p605_p4, %p61_p1  ;;  %s47_s10 = sadd.s32 1, %s875_s20 }
  0x13   : > { %p40_p7 = scmp.ge.s32.totalorder %s38_s9, 2  ;;  %p54_p8 = scmp.ne.s32.totalorder %s875_s20, %s871_s19 }
  0x14   : > { %608 = dma.hbm_to_vmem [thread:$0]  (!%p606_p5), %s209_s27, 256, %s211_s30, [#allocation6], %s890_s6, %s890_s6, %s891_s7  }
  0x15   : > { %p55_p9 = scmp.eq.s32.totalorder %s887_s23, 0  ;;  %p60_p10 = scmp.ne.s32.totalorder %s871_s19, %s867_s18 }
  0x16   : > { %s1140_s9 = smov (%p40_p7, %s38_s9), 0  ;;  %p128_p13 = scmp.eq.s32.totalorder %s955_s24, 1 }
  0x17   : > { %p982_p11 = por %p55_p9, %p54_p8  ;;  %p988_p12 = por %p61_p1, %p60_p10 }
  0x18   : > { %s42_s13 = ssub.s32 %s883_s22, %s1140_s9  ;;  %p134_p2 = scmp.eq.s32.totalorder %s1125_s8, 1 }
  0x19   : > { %p45_p0 = scmp.eq.s32.totalorder %s42_s13, 0  ;;  %p997_p4 = por %p128_p13, %p54_p8 }
  0x1a   : > { %p624_p5 = scmp.lt.s32.totalorder %s887_s23, 2  ;;  %p1005_p7 = por %p134_p2, %p60_p10 }
  0x1b   : > { %s1003_s15 = scalar_select %p45_p0, %s875_s20, %s47_s10  }
  0x1c   : > { %s227_s17 = sand.u32 1, %s875_s20   ;;  %s567_s26 = sshll.u32 %s883_s22, 2 }
  0x1d   : > { %s566_s25 = sshll.u32 %s227_s17, 2  ;;  %s1132_s0 = sld [smem:[#allocation15_spill]] }
  0x1e   : > { %s231_s6 = scalar_lea.vmem [#allocation2], %s566_s25  ;;  %p610_p8 = pnand %p624_p5, %p982_p11 }
  0x1f   : > { %s240_s7 = sshll.u32 %s231_s6, 4  ;;  %s228_s10 = scalar_lea.sflag [#allocation3], %s227_s17  ;;  %s241_s7 = int_to_ptr.vmem [resolvable:$true] %s240_s7 }
  0x20   : > { %s1019_s8 = sand.u32 (!%p963_p3), 1, %s871_s19  }
  0x21   : > { %249 = sbr.rel (%p963_p3) target bundleno = 310 (0x136), region = 32  ;;  %s1022_s27 = sshll.u32 (!%p963_p3), %s1019_s8, 2 }
  0x22   : > { %s252_s25 = scalar_lea.sflag (!%p963_p3), [#allocation3], %s1019_s8 }
  0x23   : > { %s236_s30 = scalar_lea.hbm %s1132_s0, %s567_s26  ;;  %s255_s26 = scalar_lea.vmem (!%p963_p3), [#allocation2], %s1022_s27 }
  0x24   : > { %s238_s13 = sshll.u32 %s236_s30, 4  ;;  %s239_s13 = int_to_ptr.hbm [resolvable:$true] %s238_s13 }
  0x25   : > { %612 = dma.hbm_to_vmem [thread:$0]  (!%p610_p8), %s239_s13, 64, %s241_s7, %s228_s10  }
  0x26   : > { %850 = dma.done.wait (%p988_p12), %s252_s25, 64  }
  0x27   : > { %852 = vsyncadd (%p988_p12), %s252_s25, 4294967232 }
  0x28   : > { %854 = dma.done.wait (%p61_p1), [#allocation6], 256  }
  0x29   : > { %856 = vsyncadd (%p61_p1), [#allocation6], 4294967040  ;;  %v592_v0 = vld [vmem:[#allocation5 + $0x8] sm:$0xff]  ;;  %v591_v1 = vld [vmem:[#allocation5] sm:$0xff]  ;;  %vm320_vm0 = vcmask 261120   ;;  %s1038_s12 = sshll.u32 %s879_s21, 2 }
  0x2a   : > { %330 = vmatpush.bf16.msra.mxu0 %v592_v0  ;;  %v299_v2 = vld [vmem:[%s255_s26] sm:$0xf]  ;;  %s371_s30 = scalar_lea.hbm %s1122_s3, %s1038_s12  ;;  %vm338_vm1 = vcmask 257024   ;;  %s283_s6 = scalar_lea.vmem [#allocation7], %s1022_s27 }
  0x2b   : > { %v680_v3 = vld [vmem:[%s1121_s2] ss:$0 sm:$0xff]  ;;  %s373_s7 = sshll.u32 %s283_s6, 4  ;;  %s375_s13 = sshll.u32 %s371_s30, 4  ;;  %s374_s7 = int_to_ptr.vmem [resolvable:$true] %s373_s7  ;;  %s376_s13 = int_to_ptr.hbm [resolvable:$true] %s375_s13 }
  0x2c   : > { %s892_s10 = smov 96   ;;  %s350_s21 = scalar_lea.sflag [#allocation4], %s1019_s8 }
  0x2d   : > { %s755_s25 = sshra.s32 %s376_s13, 4  ;;  %s761_s17 = scalar_lea.hbm %s1122_s3, 8  ;;  %s756_s25 = int_to_ptr.hbm [resolvable:$true] %s755_s25 }
  0x2e   : > { %331 = vmatpush.bf16.msra.mxu0 %v591_v1  ;;  %s757_s26 = scalar_lea.hbm %s756_s25, 4  ;;  %p762_p10 = scmp.lt.s32.totalorder %s756_s25, %s1122_s3 }
  0x2f   : > { %p758_p1 = scmp.ne.s32.totalorder %s756_s25, %s757_s26  ;;  %p763_p11 = scmp.lt.s32.totalorder %s761_s17, %s757_s26 }
  0x31   : > { %582 = vmatmul.msk.bf16.vlgmr.msra.gmra.mxu0 %vm320_vm0, %v299_v2  ;;  %p759_p3 = pnand %p758_p1, %p997_p4  ;;  %p764_p12 = por %p763_p11, %p762_p10 }
  0x33   : > { %p760_p9 = pneg %p759_p3 }
  0x35   : > { %p765_p13 = pnand %p764_p12, %p760_p9 }
  0xae   : > { %v333_v4 = vpop.f32.mrf.mxu0 }
  0xaf   : > { %v334_v5 = vadd.f32 %v680_v3, %v333_v4 }
  0xb1   : > { %v337_v6 = vpack.c.bf16 %v334_v5, %v334_v5 }
  0xb3   : > { %341 = vrot.lane.b32.xlu0 %v337_v6, %s892_s10  ;;  %339 = vst.msk [vmem:[%s283_s6] sm:$0xf] %vm338_vm1, %v337_v6 }
  0xb4   : > { %768 = shalt.err (!%p765_p13)
}
  0xb5   : > { %599 = dma.vmem_to_hbm [thread:$0]  (%p997_p4), %s374_s7, 64, %s376_s13, %s350_s21  }
  0xb6   : > { %v335_v7 = vpop.f32.mrf.mxu0  ;;  %s893_s8 = smov 64   ;;  %s386_s28 = scalar_lea.hbm %s1123_s4, %s1038_s12 }
  0xb7   : > { %s354_s25 = sand.u32 1, %s955_s24   ;;  %s290_s26 = scalar_lea.vmem [#allocation8], %s1022_s27 }
  0xb8   : > { %s388_s11 = sshll.u32 %s290_s26, 4  ;;  %s390_s17 = sshll.u32 %s386_s28, 4  ;;  %s389_s11 = int_to_ptr.vmem [resolvable:$true] %s388_s11  ;;  %s391_s17 = int_to_ptr.hbm [resolvable:$true] %s390_s17 }
  0xb9   : > { %s401_s7 = scalar_lea.hbm %s1124_s5, %s1038_s12  ;;  %s1068_s13 = scalar_lea.sflag [#allocation9], %s354_s25 }
  0xba   : > { %s783_s21 = sshra.s32 %s391_s17, 4  ;;  %s789_s10 = scalar_lea.hbm %s1123_s4, 8  ;;  %s784_s21 = int_to_ptr.hbm [resolvable:$true] %s783_s21 }
  0xbb   : > { %345 = vrot.lane.b32.xlu0 %v337_v6, %s893_s8  ;;  %s785_s8 = scalar_lea.hbm %s784_s21, 4  ;;  %p790_p8 = scmp.lt.s32.totalorder %s784_s21, %s1123_s4 }
  0xbc   : > { %p786_p0 = scmp.ne.s32.totalorder %s784_s21, %s785_s8  ;;  %p791_p1 = scmp.lt.s32.totalorder %s789_s10, %s785_s8 }
  0xbe   : > { %p787_p2 = pnand %p786_p0, %p997_p4  ;;  %p792_p3 = por %p791_p1, %p790_p8 }
  0xc0   : > { %p788_p5 = pneg %p787_p2 }
  0xc2   : > { %p793_p9 = pnand %p792_p3, %p788_p5 }
 0x125   : > { %v342_v8 = vpop.permute.xlu0 %341 }
 0x126   : > { %344 = vst.msk [vmem:[%s290_s26] sm:$0xf] %vm338_vm1, %v342_v8 }
 0x127   : > { %796 = shalt.err (!%p793_p9)
}
 0x128   : > { %600 = dma.vmem_to_hbm [thread:$0]  (%p997_p4), %s389_s11, 64, %s391_s17, %s1068_s13  }
 0x129   : > { %s297_s12 = scalar_lea.vmem [#allocation10], %s1022_s27  ;;  %s405_s26 = sshll.u32 %s401_s7, 4  ;;  %s406_s26 = int_to_ptr.hbm [resolvable:$true] %s405_s26 }
 0x12a   : > { %s403_s25 = sshll.u32 %s297_s12, 4  ;;  %s811_s0 = sshra.s32 %s406_s26, 4  ;;  %s404_s25 = int_to_ptr.vmem [resolvable:$true] %s403_s25  ;;  %s812_s0 = int_to_ptr.hbm [resolvable:$true] %s811_s0 }
 0x12b   : > { %s813_s29 = scalar_lea.hbm %s812_s0, 4  ;;  %s817_s8 = scalar_lea.hbm %s1124_s5, 8 }
 0x12c   : > { %p814_p10 = scmp.ne.s32.totalorder %s812_s0, %s813_s29  ;;  %p818_p13 = scmp.lt.s32.totalorder %s812_s0, %s1124_s5 }
 0x12d   : > { %v346_v9 = vpop.permute.xlu0 %345  ;;  %p819_p0 = scmp.lt.s32.totalorder %s817_s8, %s813_s29 }
 0x12e   : > { %348 = vst.msk [vmem:[%s297_s12] sm:$0xf] %vm338_vm1, %v346_v9  ;;  %p815_p11 = pnand %p814_p10, %p997_p4 }
 0x12f   : > { %p820_p2 = por %p819_p0, %p818_p13 }
 0x130   : > { %p816_p12 = pneg %p815_p11 }
 0x132   : > { %p821_p5 = pnand %p820_p2, %p816_p12 }
 0x134   : > { %824 = shalt.err (!%p821_p5)
}
 0x135   : > { %601 = dma.vmem_to_hbm [thread:$0]  (%p997_p4), %s404_s25, 64, %s406_s26, %s1068_s13  }
 0x136 PF: > { %s417_s17 = sand.u32 1, %s867_s18   ;;  %p614_p8 = pnand %p565_p6, %p1005_p7 }
 0x137   : > { %s418_s7 = scalar_lea.sflag [#allocation4], %s417_s17 }
 0x138   : > { %p615_p1 = pneg %p614_p8 }
 0x13a   : > { %858 = dma.done.wait (%p615_p1), %s418_s7, 64  }
 0x13b   : > { %860 = vsyncadd (%p615_p1), %s418_s7, 4294967232  ;;  %s1133_s24 = sadd.s32 4294967294, %s887_s23  }
 0x13c   : > { %s427_s6 = sand.u32 1, %s1133_s24  }
 0x13d   : > { %s428_s10 = scalar_lea.sflag [#allocation9], %s427_s6 }
 0x13e   : > { %862 = dma.done.wait (%p615_p1), %s428_s10, 128  }
 0x13f   : > { %864 = vsyncadd (%p615_p1), %s428_s10, 4294967168  ;;  %s26_s23 = sadd.s32 1, %s887_s23   ;;  %s1134_s18 = smov %s871_s19 }
 0x140   : > { %p23_p4 = scmp.ge.s32.totalorder %s26_s23, 4   ;;  %s1135_s19 = smov %s875_s20 }
 0x141   : > { %s1136_s20 = smov %s1003_s15  ;;  %s1137_s21 = smov %s883_s22 }
 0x142   : > { %s1138_s22 = smov %s1140_s9  ;;  %25 = sbr.rel (!%p23_p4) target bundleno = 11 (0xb), region = 113 }
 0x147   :  { %444 = vsyncpa [#allocation3], 1 }
 0x148   :  { %446 = vsyncpa [#allocation3 + $0x1], 1 }
 0x149   :  { %447 = vsyncpa [#allocation6], 1 }
 0x14a   :  { %448 = vsyncpa [#allocation4], 1 }
 0x14b   :  { %450 = vsyncpa [#allocation4 + $0x1], 1 }
 0x14c   :  { %451 = vsyncpa [#allocation9], 1 }
 0x14d   :  { %453 = vsyncpa [#allocation9 + $0x1], 1 }

</bundles_post_ra>
